<compile_context>
chip_gen: v7x
topology: tpu7x:2x2x1
jax: 0.10.0
libtpu: 0.0.40
codegen_flags: <defaults>
</compile_context>

<pallas_src>
import functools
import math

import jax
import jax.numpy as jnp
from jax.experimental import pallas as pl
from jax.experimental.pallas import tpu as pltpu

_LANES = 128                     # vreg lane width
_TARGET_BLOCK_BYTES = 2 << 20    # ~2 MiB per operand block (safe on v5e/v6e/v7x)
_SMALL_N = 2048                  # below this, run as one full-array block
_VMEM_LIMIT = 32 * 1024 * 1024   # x + out double-buffered (~8 MiB) + headroom


def _kernel_const(rank_val, x_ref, p_ref, o_ref):
    # One fused elementwise add.  p_ref broadcasts over rows when it is the
    # resident (1, 128) lane pattern.  rank_val is a weak-typed Python constant
    # closed over at trace time, so it does not upcast bf16/f32 tiles.
    o_ref[...] = x_ref[...] + p_ref[...] + rank_val


def _kernel_smem(rank_ref, x_ref, p_ref, o_ref):
    # Runtime rank: a single 32-bit SMEM scalar, cast to the tile dtype inside
    # the kernel so a bf16 tile is not silently promoted to f32.
    rank_val = rank_ref[0].astype(o_ref.dtype)
    o_ref[...] = x_ref[...] + p_ref[...] + rank_val


def _static_rank_value(rank, dtype):
    if jnp.issubdtype(dtype, jnp.floating):
        return float(rank)
    return int(rank)


def module_for_ddp_comm_hook(x, rank, p):
    """Computes p + (x + rank) -- the exact forward of ModuleForDdpCommHook."""
    x = jnp.asarray(x)
    p = jnp.asarray(p)
    out_shape = jnp.broadcast_shapes(x.shape, p.shape)
    dtype = jnp.result_type(x.dtype, p.dtype)
    n = math.prod(out_shape) if out_shape else 1

    static_rank = isinstance(rank, (int, float))
    if static_rank:
        kernel = functools.partial(_kernel_const, _static_rank_value(rank, dtype))
        rank_inputs = ()
        rank_specs = ()
    else:
        rank_dtype = jnp.float32 if jnp.issubdtype(dtype, jnp.floating) else jnp.int32
        rank_arr = jnp.asarray(rank, rank_dtype).reshape((1,))
        kernel = _kernel_smem
        rank_inputs = (rank_arr,)
        rank_specs = (pl.BlockSpec(memory_space=pltpu.MemorySpace.SMEM),)

    vmem_full = pl.BlockSpec(memory_space=pltpu.MemorySpace.VMEM)

    # ------------- small path: one full-array block, zero wrapper copies -----
    if n <= _SMALL_N:
        x_b = jnp.broadcast_to(x, out_shape).astype(dtype)
        p_b = jnp.broadcast_to(p, out_shape).astype(dtype)
        return pl.pallas_call(
            kernel,
            out_shape=jax.ShapeDtypeStruct(out_shape, dtype),
            in_specs=[*rank_specs, vmem_full, vmem_full],
            out_specs=vmem_full,
        )(*rank_inputs, x_b, p_b)

    # ------------- large path: lane-dense row tiles, resident p --------------
    itemsize = jnp.dtype(dtype).itemsize
    sub = max(8, 32 // itemsize)          # 8 (f32) / 16 (bf16) / 32 (int8)

    x_flat = jnp.broadcast_to(x, out_shape).astype(dtype).reshape(-1)
    n_pad = _LANES * pl.cdiv(n, _LANES)
    if n_pad != n:
        # TODO(synk): handle the ragged lane tail in-kernel instead of padding.
        x_flat = jnp.pad(x_flat, (0, n_pad - n))
    rows = n_pad // _LANES
    x2 = x_flat.reshape(rows, _LANES)

    # p collapses to one (1, 128) lane pattern whenever the output's trailing
    # dims equal p's shape (always true here: p is (2, 2) and 128 % 4 == 0),
    # so every slab row sees identical p values -> DMA p once, keep resident.
    p_trailing = out_shape[len(out_shape) - p.ndim:] if p.ndim else ()
    if p.size > 0 and _LANES % p.size == 0 and tuple(p_trailing) == tuple(p.shape):
        p_op = jnp.tile(p.reshape(-1).astype(dtype), _LANES // p.size).reshape(1, _LANES)
        p_resident = True
    else:
        # TODO(synk): rare fallback -- stream a broadcast p slab when p does not
        # align with the output's trailing dims.
        p_flat = jnp.broadcast_to(p, out_shape).astype(dtype).reshape(-1)
        if n_pad != n:
            p_flat = jnp.pad(p_flat, (0, n_pad - n))
        p_op = p_flat.reshape(rows, _LANES)
        p_resident = False

    # Block geometry: ~2 MiB per operand block, dtype-aware sublane multiple,
    # and >= 2 row-blocks when possible so both v7x TensorCores get work.
    rows_min = sub * pl.cdiv(rows, sub)
    target_rows = max(sub, (_TARGET_BLOCK_BYTES // (_LANES * itemsize)) // sub * sub)
    if rows_min > target_rows:
        block_rows = target_rows
    elif rows_min >= 2 * sub:
        block_rows = sub * pl.cdiv(pl.cdiv(rows_min, 2), sub)
    else:
        block_rows = rows_min
    grid = (pl.cdiv(rows, block_rows),)

    x_spec = pl.BlockSpec((block_rows, _LANES), lambda i: (i, 0),
                          memory_space=pltpu.MemorySpace.VMEM)
    if p_resident:
        p_spec = pl.BlockSpec((1, _LANES), lambda i: (0, 0),
                              memory_space=pltpu.MemorySpace.VMEM)  # DMA'd once
    else:
        p_spec = x_spec

    out2 = pl.pallas_call(
        kernel,
        out_shape=jax.ShapeDtypeStruct((rows, _LANES), dtype),
        grid=grid,
        in_specs=[*rank_specs, x_spec, p_spec],
        out_specs=x_spec,
        input_output_aliases={len(rank_inputs): 0},  # write in place of x slab
        compiler_params=pltpu.CompilerParams(
            dimension_semantics=("parallel",),
            vmem_limit_bytes=_VMEM_LIMIT,
        ),
    )(*rank_inputs, x2, p_op)

    out_flat = out2.reshape(-1)
    if n_pad != n:
        out_flat = out_flat[:n]
    return out_flat.reshape(out_shape)


if __name__ == "__main__":
    p = jnp.ones((2, 2), dtype=jnp.float32)              # Task.p = torch.ones(2, 2)

    # Canonical module usage: x is (2, 2), rank is a static per-process int.
    x = jax.random.normal(jax.random.PRNGKey(0), (2, 2), dtype=jnp.float32)
    rank = 3
    fwd = jax.jit(module_for_ddp_comm_hook, static_argnums=1)
    out = jax.block_until_ready(fwd(x, rank, p))
    ref = p + (x + jnp.float32(rank))
    assert out.shape == ref.shape and out.dtype == ref.dtype, (out.shape, ref.shape)
    assert jnp.allclose(out, ref, atol=1e-6)

    # Batched x broadcasting against p with a runtime (traced) rank: exercises
    # the SMEM-scalar path.
    xb = jax.random.normal(jax.random.PRNGKey(1), (4, 2, 2), dtype=jnp.float32)
    rank_rt = jnp.int32(2)
    fwd_rt = jax.jit(module_for_ddp_comm_hook)
    out_b = jax.block_until_ready(fwd_rt(xb, rank_rt, p))
    ref_b = p + (xb + 2.0)
    assert jnp.allclose(out_b, ref_b, atol=1e-6)

    # Bucket-shaped input: exercises the tiled path with the resident (1, 128)
    # p lane pattern, in-place x/out aliasing and a >= 2-block parallel grid.
    xl = jax.random.normal(jax.random.PRNGKey(2), (1024, 2, 2), dtype=jnp.float32)
    out_l = jax.block_until_ready(fwd(xl, rank, p))
    ref_l = p + (xl + jnp.float32(rank))
    assert out_l.shape == ref_l.shape and jnp.allclose(out_l, ref_l, atol=1e-6)

    print("KERNEL_OK")
</pallas_src>

<mosaic_0001>
module attributes {stable_mosaic.version = 11 : i64} {
  func.func @_kernel_const(%arg0: memref<2x2xf32, #tpu.memory_space<vmem>>, %arg1: memref<2x2xf32, #tpu.memory_space<vmem>>, %arg2: memref<2x2xf32, #tpu.memory_space<vmem>>) attributes {dimension_semantics = [], scalar_prefetch = 0 : i64, scratch_operands = 0 : i64, tpu.core_type = #tpu.core_type<tc>} {
    %c0 = arith.constant 0 : index
    %c0_0 = arith.constant 0 : index
    %0 = vector.load %arg0[%c0, %c0_0] : memref<2x2xf32, #tpu.memory_space<vmem>>, vector<2x2xf32>
    %c0_1 = arith.constant 0 : index
    %c0_2 = arith.constant 0 : index
    %1 = vector.load %arg1[%c0_1, %c0_2] : memref<2x2xf32, #tpu.memory_space<vmem>>, vector<2x2xf32>
    %2 = arith.addf %0, %1 : vector<2x2xf32>
    %cst = arith.constant 3.000000e+00 : f32
    %3 = vector.broadcast %cst : f32 to vector<2x2xf32>
    %4 = arith.addf %2, %3 : vector<2x2xf32>
    %c0_3 = arith.constant 0 : index
    %c0_4 = arith.constant 0 : index
    %5 = vector.load %arg2[%c0_3, %c0_4] : memref<2x2xf32, #tpu.memory_space<vmem>>, vector<2x2xf32>
    tpu.vector_store %arg2[%c0_3, %c0_4], %4 {strides = array<i32>} : memref<2x2xf32, #tpu.memory_space<vmem>>, vector<2x2xf32>,
    return
  }
}

</mosaic_0001>

<bundles_post_ra>
// kernel: module_for_ddp_comm_hook.1
= control target key start
LH: loop header
LB: loop body
LE: loop exit
PB: predicated region body
PF: predicated region fallthrough
CT: control target
= control target key end

     0   :  { %7 = vsyncpa [#allocation3], 0  ;;  %s139_s0 = inlined_call_operand.hbm [shape: f32[2,2], index: 0, kind: input, shape index: {}]   ;;  %s140_s1 = inlined_call_operand.vmem [shape: f32[2,2], index: 1, kind: input, shape index: {}]   ;;  %s141_s2 = inlined_call_operand.hbm [shape: f32[2,2], index: 2, kind: output, shape index: {}]  }
   0x1   :  { %8 = vsyncpa [#allocation4], 0  ;;  %s95_s9 = smov [#allocation2]   ;;  %s47_s13 = scalar_lea.hbm %s139_s0, 32 }
   0x2   :  { %s15_s10 = sshll.u32 %s95_s9, 4  ;;  %p48_p0 = scmp.ne.s32.totalorder %s139_s0, %s47_s13  ;;  %s16_s10 = int_to_ptr.vmem [resolvable:$true] %s15_s10 }
   0x3   :  { %p51_p1 = scmp.lt.u32.totalorder %s47_s13, %s139_s0 }
   0x5   :  { %p53_p2 = pnand %p51_p1, %p48_p0 }
   0x7   :  { %56 = shalt.err (!%p53_p2)
}
   0x8   :  { %s57_s18 = scalar_lea.vmem %s16_s10, 32  ;;  %p62_p4 = scmp.lt.s32.totalorder %s16_s10, %s16_s10 }
   0x9   :  { %p58_p3 = scmp.ne.s32.totalorder %s16_s10, %s57_s18  ;;  %p63_p5 = scmp.lt.s32.totalorder %s57_s18, %s57_s18 }
   0xb   :  { %p64_p6 = por %p63_p5, %p62_p4 }
   0xd   :  { %p65_p7 = pnand %p64_p6, %p58_p3 }
   0xf   :  { %68 = shalt.err (!%p65_p7)
}
  0x10   :  { %18 = dma.hbm_to_vmem [thread:$0]  %s139_s0, 32, %s16_s10, [#allocation3]  }
  0x11   :  { %91 = dma.done.wait [#allocation3], 32  }
  0x12   :  { %92 = vsyncadd [#allocation3], 4294967264  ;;  %v24_v0 = vld [vmem:[#allocation2] sm:$0x3]  ;;  %s96_s23 = smov [#allocation5]   ;;  %vm28_vm0 = vcmask 9216  }
  0x13   :  { %v25_v1 = vld [vmem:[%s140_s1] sm:$0x3]  ;;  %s36_s24 = sshll.u32 %s96_s23, 4  ;;  %s37_s24 = int_to_ptr.vmem [resolvable:$true] %s36_s24 }
  0x14   :  { %v26_v2 = vadd.f32 %v25_v1, %v24_v0  ;;  %s69_s25 = scalar_lea.vmem %s37_s24, 32  ;;  %p74_p9 = scmp.lt.s32.totalorder %s37_s24, %s37_s24 }
  0x15   :  { %p70_p8 = scmp.ne.s32.totalorder %s37_s24, %s69_s25  ;;  %p75_p10 = scmp.lt.s32.totalorder %s69_s25, %s69_s25 }
  0x16   :  { %v27_v3 = vadd.f32 3.0, %v26_v2 }
  0x17   :  { %p76_p11 = por %p75_p10, %p74_p9 }
  0x18   :  { %29 = vst.msk [vmem:[#allocation5] sm:$0x3] %vm28_vm0, %v27_v3 }
  0x19   :  { %p77_p12 = pnand %p76_p11, %p70_p8 }
  0x1b   :  { %80 = shalt.err (!%p77_p12)
}
  0x1c   :  { %s81_s27 = scalar_lea.hbm %s141_s2, 32 }
  0x1d   :  { %p82_p13 = scmp.ne.s32.totalorder %s141_s2, %s81_s27  ;;  %p85_p0 = scmp.lt.u32.totalorder %s81_s27, %s141_s2 }
  0x1f   :  { %p87_p1 = pnand %p85_p0, %p82_p13 }
  0x21   :  { %90 = shalt.err (!%p87_p1)
}
  0x22   :  { %39 = dma.vmem_to_hbm [thread:$0]  %s37_s24, 32, %s141_s2, [#allocation4]  }
  0x23   :  { %93 = dma.done.wait [#allocation4], 32  }
  0x24   :  { %94 = vsyncadd [#allocation4], 4294967264 }
  0x25   :  { %43 = vsyncpa [#allocation3], 1 }
  0x26   :  { %44 = vsyncpa [#allocation4], 1 }

</bundles_post_ra>
